<compile_context>
chip_gen: v5e
topology: v5e:2x2
jax: 0.10.0
libtpu: 0.0.40
codegen_flags: <defaults>
</compile_context>

<pallas_src>
import math

import jax
import jax.numpy as jnp
from jax import lax
from jax.experimental import pallas as pl
from jax.experimental.pallas import tpu as pltpu


_NEG_BIG = jnp.float32(-9000000000000000.0)   # module's masking constant


def _expm1(z):
    # expm1 built from exp + a 2-term series near 0 (lax.expm1 has no guaranteed
    # Mosaic lowering). Addresses the accuracy-near-zero review note; error ~1e-10
    # where it matters, exp()-1 elsewhere.
    return jnp.where(jnp.abs(z) < 1e-3, z + 0.5 * z * z, jnp.exp(z) - 1.0)


def _make_gat_kernel(block_b, block_q, n_node, d_in, d_pad, n_q_tiles, fast):
    """Kernel closure. Grid = (B // block_b, n_q_tiles); row-tile axis is inner."""

    def kernel(x_ref, w_ref, bias_ref, out_ref, xw_ref):
        qi = pl.program_id(1)

        # Compute xW for the whole batch-block once (first row tile) and keep it
        # resident in VMEM scratch for every row tile of this batch-block.
        @pl.when(qi == 0)
        def _():
            # One (block_b*N, D_in) @ (D_in, D_pad) matmul fills MXU rows even
            # for tiny graphs.
            x2d = x_ref[...].reshape(block_b * n_node, d_in)
            xw = jnp.dot(x2d, w_ref[...], preferred_element_type=jnp.float32)
            xw_ref[...] = xw.reshape(block_b, n_node, d_pad)

        xw_all = xw_ref[...]                                    # (Bt, N, Dp) f32
        if n_q_tiles == 1:
            q = xw_all                                          # no slice needed
        else:
            q_start = pl.multiple_of(qi * block_q, block_q)
            q = xw_ref[:, pl.ds(q_start, block_q), :]           # (Bt, TQ, Dp)

        if fast:
            q_mm = q.astype(jnp.bfloat16)
            kv_mm = xw_all.astype(jnp.bfloat16)
        else:
            q_mm, kv_mm = q, xw_all

        # score = q @ xW^T : contract feature axes via dot_general operand
        # routing (no transpose copy of xW), batched over the graphs in block.
        score = lax.dot_general(
            q_mm, kv_mm,
            dimension_numbers=(((2,), (2,)), ((0,), (0,))),
            preferred_element_type=jnp.float32)                 # (Bt, TQ, N)
        # bias already holds A on kept edges and -9e15 on masked edges.
        score = score + bias_ref[...]

        # Row softmax (numerically stable, f32).
        m = jnp.max(score, axis=-1, keepdims=True)
        e = jnp.exp(score - m)
        denom = jnp.sum(e, axis=-1, keepdims=True)
        if fast:
            attention = e * pl.reciprocal(denom, approx=True)   # EUP vrcp, ~free
            attention = attention.astype(jnp.bfloat16)
        else:
            attention = e / denom

        z = lax.dot_general(
            attention, kv_mm,
            dimension_numbers=(((2,), (1,)), ((0,), (0,))),
            preferred_element_type=jnp.float32)                 # (Bt, TQ, Dp)

        # ELU (alpha = 1); dropout(p, training=False) is identity.
        out_ref[...] = jnp.where(z > 0, z, _expm1(z)).astype(out_ref.dtype)

    return kernel


def _pick_vmem_limit():
    # ~75% of physical VMEM: 96 MiB on v5e/v6e (128 MiB), 48 MiB on v7x (64 MiB).
    try:
        cap = pltpu.get_tpu_info().vmem_capacity_bytes
    except Exception:
        cap = 64 * 1024 * 1024
    return int(cap) * 3 // 4


def graph_attention_layer(x, w, adj, a_bias, *, block_b=None, block_q=None,
                          fast=False):
    """
    x:      (B, N, D_in)  float32
    w:      (D_in, D_out) float32
    adj:    (B, N, N)     any dtype; edges are `adj > 0`
    a_bias: (B, N, N)     float32 additive attention bias (module's `A`)
    """
    B, N, D_in = x.shape
    D_out = w.shape[1]

    # Pre-fold the adjacency mask into the additive bias so the kernel reads a
    # single (B,N,N) f32 stream. Bit-identical to where(adj>0, score+A, -9e15)
    # because |score| << 9e15 so score + (-9e15) rounds to -9e15 in f32.
    # Callers that reuse the same graph across layers should hoist this fold.
    bias = jnp.where(adj > 0, a_bias.astype(jnp.float32), _NEG_BIG)

    # Lane-dense output: pad D_out up to a multiple of 128 lanes, slice after.
    d_pad = ((D_out + 127) // 128) * 128
    w_p = w if d_pad == D_out else jnp.pad(w, ((0, 0), (0, d_pad - D_out)))

    if block_q is None:
        block_q = N if N <= 256 else next(
            (t for t in range(256, 7, -8) if N % t == 0), N)
    if block_b is None:
        block_b = max(1, min(B, 512 // max(N, 1)))
        while B % block_b:
            block_b -= 1
    assert B % block_b == 0, (B, block_b)
    assert N % block_q == 0, (N, block_q)

    n_q_tiles = N // block_q
    grid = (B // block_b, n_q_tiles)

    kernel = _make_gat_kernel(block_b, block_q, N, D_in, d_pad, n_q_tiles, fast)

    # (v5e note: if DMA on the bias stream is exposed, pipeline_mode=pl.Buffered(3)
    #  on its BlockSpec is the next knob to try.)
    out = pl.pallas_call(
        kernel,
        out_shape=jax.ShapeDtypeStruct((B, N, d_pad), jnp.float32),
        grid_spec=pltpu.PrefetchScalarGridSpec(
            num_scalar_prefetch=0,
            grid=grid,
            in_specs=[
                pl.BlockSpec((block_b, N, D_in), lambda bi, qi: (bi, 0, 0)),
                pl.BlockSpec((D_in, d_pad), lambda bi, qi: (0, 0)),
                pl.BlockSpec((block_b, block_q, N), lambda bi, qi: (bi, qi, 0)),
            ],
            out_specs=pl.BlockSpec((block_b, block_q, d_pad),
                                   lambda bi, qi: (bi, qi, 0)),
            scratch_shapes=[pltpu.VMEM((block_b, N, d_pad), jnp.float32)],
        ),
        compiler_params=pltpu.CompilerParams(
            dimension_semantics=("parallel", "arbitrary"),
            vmem_limit_bytes=_pick_vmem_limit(),
        ),
    )(x, w_p, bias)

    return out if d_pad == D_out else out[..., :D_out]


def _init_weight(key, dim_input, dim_output, negative_slope=0.01):
    # nn.init.xavier_uniform_ with gain = calculate_gain('leaky_relu', slope)
    gain = math.sqrt(2.0 / (1.0 + negative_slope ** 2))
    bound = gain * math.sqrt(6.0 / (dim_input + dim_output))
    return jax.random.uniform(key, (dim_input, dim_output), dtype=jnp.float32,
                              minval=-bound, maxval=bound)


def _reference(x, w, adj, a_bias):
    xw = jnp.matmul(x, w)
    score = jnp.matmul(xw, jnp.swapaxes(xw, -2, -1)) + a_bias
    masked = jnp.where(adj > 0, score, _NEG_BIG)
    attention = jax.nn.softmax(masked, axis=-1)
    return jax.nn.elu(jnp.matmul(attention, xw))


if __name__ == "__main__":
    key = jax.random.PRNGKey(0)
    k_w, k_x, k_adj, k_a = jax.random.split(key, 4)

    B, N, D_in, D_out = 4, 8, 16, 32

    w = _init_weight(k_w, D_in, D_out)
    x = jax.random.normal(k_x, (B, N, D_in), dtype=jnp.float32)
    # Random 0/1 adjacency with guaranteed self-loops (every row has >= 1 edge).
    adj = (jax.random.uniform(k_adj, (B, N, N)) > 0.5).astype(jnp.float32)
    adj = jnp.maximum(adj, jnp.eye(N, dtype=jnp.float32)[None, :, :])
    a_bias = 0.1 * jax.random.normal(k_a, (B, N, N), dtype=jnp.float32)

    ref = _reference(x, w, adj, a_bias)

    # Exact path: f32 MXU + exact softmax division -- matches module numerics.
    out = graph_attention_layer(x, w, adj, a_bias, block_b=2)
    out = jax.block_until_ready(out)
    assert out.shape == (B, N, D_out)
    assert jnp.allclose(out, ref, atol=1e-4, rtol=1e-4), "exact path mismatch"

    # Fast path: bf16 MXU operands (f32 accumulation) + approx EUP reciprocal.
    out_fast = graph_attention_layer(x, w, adj, a_bias, block_b=2, fast=True)
    out_fast = jax.block_until_ready(out_fast)
    assert out_fast.shape == (B, N, D_out)
    assert bool(jnp.all(jnp.isfinite(out_fast)))
    assert float(jnp.max(jnp.abs(out_fast - ref))) < 0.25, "fast path diverged"

    print("KERNEL_OK")
</pallas_src>

<mosaic_0001>
module attributes {stable_mosaic.version = 11 : i64} {
  func.func @kernel(%arg0: i32, %arg1: i32, %arg2: memref<2x8x16xf32, #tpu.memory_space<vmem>>, %arg3: memref<16x128xf32, #tpu.memory_space<vmem>>, %arg4: memref<2x8x8xf32, #tpu.memory_space<vmem>>, %arg5: memref<2x8x128xf32, #tpu.memory_space<vmem>>, %arg6: memref<2x8x128xf32, #tpu.memory_space<vmem>>) attributes {dimension_semantics = [#tpu.dimension_semantics<parallel>, #tpu.dimension_semantics<arbitrary>], iteration_bounds = array<i64: 2, 1>, scalar_prefetch = 0 : i64, scratch_operands = 1 : i64, tpu.core_type = #tpu.core_type<tc>, window_params = [{transform_indices = @transform_0, window_bounds = array<i64: 2, 8, 16>}, {pipeline_mode = #tpu.pipeline_mode<synchronous>, transform_indices = @transform_1, window_bounds = array<i64: 16, 128>}, {transform_indices = @transform_2, window_bounds = array<i64: 2, 8, 8>}, {transform_indices = @transform_3, window_bounds = array<i64: 2, 8, 128>}]} {
    %c0_i32 = arith.constant 0 : i32
    %0 = arith.cmpi eq, %arg1, %c0_i32 : i32
    %1 = arith.extui %0 : i1 to i32
    %c0_i32_0 = arith.constant 0 : i32
    %2 = arith.cmpi ne, %1, %c0_i32_0 : i32
    scf.if %2 {
      %c0_16 = arith.constant 0 : index
      %c0_17 = arith.constant 0 : index
      %c0_18 = arith.constant 0 : index
      %32 = vector.load %arg2[%c0_16, %c0_17, %c0_18] : memref<2x8x16xf32, #tpu.memory_space<vmem>>, vector<2x8x16xf32>
      %33 = vector.shape_cast %32 : vector<2x8x16xf32> to vector<16x16xf32>
      %c0_19 = arith.constant 0 : index
      %c0_20 = arith.constant 0 : index
      %34 = vector.load %arg3[%c0_19, %c0_20] : memref<16x128xf32, #tpu.memory_space<vmem>>, vector<16x128xf32>
      %cst_21 = arith.constant dense<0.000000e+00> : vector<16x128xf32>
      %35 = tpu.matmul %33, %34, %cst_21 {dimension_numbers = #tpu.dot_dimension_numbers<[1], [0], [0], [1], [0, 0, 1, 1], [], []>} : vector<16x16xf32>, vector<16x128xf32>, vector<16x128xf32> -> vector<16x128xf32>
      %36 = vector.shape_cast %35 : vector<16x128xf32> to vector<2x8x128xf32>
      %c0_22 = arith.constant 0 : index
      %c0_23 = arith.constant 0 : index
      %c0_24 = arith.constant 0 : index
      %37 = vector.load %arg6[%c0_22, %c0_23, %c0_24] : memref<2x8x128xf32, #tpu.memory_space<vmem>>, vector<2x8x128xf32>
      tpu.vector_store %arg6[%c0_22, %c0_23, %c0_24], %36 {strides = array<i32>} : memref<2x8x128xf32, #tpu.memory_space<vmem>>, vector<2x8x128xf32>,
    } else {
    }
    %c0 = arith.constant 0 : index
    %c0_1 = arith.constant 0 : index
    %c0_2 = arith.constant 0 : index
    %3 = vector.load %arg6[%c0, %c0_1, %c0_2] : memref<2x8x128xf32, #tpu.memory_space<vmem>>, vector<2x8x128xf32>
    %cst = arith.constant dense<0.000000e+00> : vector<2x8x8xf32>
    %4 = tpu.matmul %3, %3, %cst {dimension_numbers = #tpu.dot_dimension_numbers<[2], [2], [1], [1], [0, 0, 0, 1, 1, 1], [0], [0]>} : vector<2x8x128xf32>, vector<2x8x128xf32>, vector<2x8x8xf32> -> vector<2x8x8xf32>
    %c0_3 = arith.constant 0 : index
    %c0_4 = arith.constant 0 : index
    %c0_5 = arith.constant 0 : index
    %5 = vector.load %arg4[%c0_3, %c0_4, %c0_5] : memref<2x8x8xf32, #tpu.memory_space<vmem>>, vector<2x8x8xf32>
    %6 = arith.addf %4, %5 : vector<2x8x8xf32>
    %cst_6 = arith.constant dense<0xFF800000> : vector<2x8xf32>
    %7 = vector.multi_reduction <maximumf>, %6, %cst_6 [2] : vector<2x8x8xf32> to vector<2x8xf32>
    %8 = vector.shape_cast %7 : vector<2x8xf32> to vector<2x8x1xf32>
    %9 = vector.broadcast %8 : vector<2x8x1xf32> to vector<2x8x8xf32>
    %10 = arith.subf %6, %9 : vector<2x8x8xf32>
    %11 = math.exp %10 : vector<2x8x8xf32>
    %cst_7 = arith.constant dense<0.000000e+00> : vector<2x8xf32>
    %12 = vector.multi_reduction <add>, %11, %cst_7 [2] : vector<2x8x8xf32> to vector<2x8xf32>
    %13 = vector.shape_cast %12 : vector<2x8xf32> to vector<2x8x1xf32>
    %14 = vector.broadcast %13 : vector<2x8x1xf32> to vector<2x8x8xf32>
    %15 = arith.divf %11, %14 : vector<2x8x8xf32>
    %cst_8 = arith.constant dense<0.000000e+00> : vector<2x8x128xf32>
    %16 = tpu.matmul %15, %3, %cst_8 {dimension_numbers = #tpu.dot_dimension_numbers<[2], [1], [1], [2], [0, 0, 0, 1, 1, 2], [0], [0]>} : vector<2x8x8xf32>, vector<2x8x128xf32>, vector<2x8x128xf32> -> vector<2x8x128xf32>
    %cst_9 = arith.constant 0.000000e+00 : f32
    %17 = vector.broadcast %cst_9 : f32 to vector<2x8x128xf32>
    %18 = arith.cmpf ogt, %16, %17 : vector<2x8x128xf32>
    %19 = math.absf %16 : vector<2x8x128xf32>
    %cst_10 = arith.constant 1.000000e-03 : f32
    %20 = vector.broadcast %cst_10 : f32 to vector<2x8x128xf32>
    %21 = arith.cmpf olt, %19, %20 : vector<2x8x128xf32>
    %cst_11 = arith.constant 5.000000e-01 : f32
    %22 = vector.broadcast %cst_11 : f32 to vector<2x8x128xf32>
    %23 = arith.mulf %22, %16 : vector<2x8x128xf32>
    %24 = arith.mulf %23, %16 : vector<2x8x128xf32>
    %25 = arith.addf %16, %24 : vector<2x8x128xf32>
    %26 = math.exp %16 : vector<2x8x128xf32>
    %cst_12 = arith.constant 1.000000e+00 : f32
    %27 = vector.broadcast %cst_12 : f32 to vector<2x8x128xf32>
    %28 = arith.subf %26, %27 : vector<2x8x128xf32>
    %29 = arith.select %21, %25, %28 : vector<2x8x128xi1>, vector<2x8x128xf32>
    %30 = arith.select %18, %16, %29 : vector<2x8x128xi1>, vector<2x8x128xf32>
    %c0_13 = arith.constant 0 : index
    %c0_14 = arith.constant 0 : index
    %c0_15 = arith.constant 0 : index
    %31 = vector.load %arg5[%c0_13, %c0_14, %c0_15] : memref<2x8x128xf32, #tpu.memory_space<vmem>>, vector<2x8x128xf32>
    tpu.vector_store %arg5[%c0_13, %c0_14, %c0_15], %30 {strides = array<i32>} : memref<2x8x128xf32, #tpu.memory_space<vmem>>, vector<2x8x128xf32>,
    return
  }
  func.func @transform_0(%arg0: i32, %arg1: i32) -> (i32, i32, i32) {
    %c0_i32 = arith.constant 0 : i32
    %c0_i32_0 = arith.constant 0 : i32
    %c0_i32_1 = arith.constant 0 : i32
    return %arg0, %c0_i32, %c0_i32_0 : i32, i32, i32
  }
  func.func @transform_1(%arg0: i32, %arg1: i32) -> (i32, i32) {
    %c0_i32 = arith.constant 0 : i32
    %c0_i32_0 = arith.constant 0 : i32
    %c0_i32_1 = arith.constant 0 : i32
    return %c0_i32, %c0_i32_0 : i32, i32
  }
  func.func @transform_2(%arg0: i32, %arg1: i32) -> (i32, i32, i32) {
    %c0_i32 = arith.constant 0 : i32
    %c0_i32_0 = arith.constant 0 : i32
    return %arg0, %arg1, %c0_i32 : i32, i32, i32
  }
  func.func @transform_3(%arg0: i32, %arg1: i32) -> (i32, i32, i32) {
    %c0_i32 = arith.constant 0 : i32
    %c0_i32_0 = arith.constant 0 : i32
    return %arg0, %arg1, %c0_i32 : i32, i32, i32
  }
}

</mosaic_0001>

<bundles_post_ra>
// kernel: tpu_custom_call.1
= control target key start
LH: loop header
LB: loop body
LE: loop exit
PB: predicated region body
PF: predicated region fallthrough
CT: control target
= control target key end

     0   :  { %8 = vsyncpa [#allocation4], 0  ;;  %s1114_s0 = inlined_call_operand.hbm [shape: f32[4,8,16], index: 0, kind: input, shape index: {}]   ;;  %s1115_s1 = inlined_call_operand.hbm [shape: f32[16,128], index: 1, kind: input, shape index: {}]   ;;  %s1116_s2 = inlined_call_operand.hbm [shape: f32[4,8,8], index: 2, kind: input, shape index: {}]   ;;  %s1117_s3 = inlined_call_operand.hbm [shape: f32[4,8,128], index: 3, kind: output, shape index: {}]  }
   0x1   :  { %10 = vsyncpa [#allocation4 + $0x1], 0 }
   0x2   :  { %11 = vsyncpa [#allocation7], 0 }
   0x3   :  { %12 = vsyncpa [#allocation5], 0 }
   0x4   :  { %14 = vsyncpa [#allocation5 + $0x1], 0  ;;  %s933_s12 = smov 0   ;;  %s935_s13 = smov 0  }
   0x5   :  { %s937_s14 = smov 0   ;;  %s939_s15 = smov 0  }
   0x6   :  { %s941_s16 = smov 0   ;;  %s943_s17 = smov 0  }
   0x7 LB: > { %s32_s18 = sadd.s32 1, %s902_s16  ;;  %s39_s19 = sadd.s32 1, %s894_s14  ;;  %s906_s17 = sphi %s943_s17, %s20_s17   ;;  %s902_s16 = sphi %s941_s16, %s1127_s16   ;;  %s898_s15 = sphi %s939_s15, %s1126_s15   ;;  %s894_s14 = sphi %s937_s14, %s1125_s14   ;;  %s890_s13 = sphi %s935_s13, %s1124_s13   ;;  %s886_s12 = sphi %s933_s12, %s1123_s12  }
   0x8   : > { %p34_p0 = scmp.ge.s32.totalorder %s32_s18, 2  ;;  %p46_p1 = scmp.ne.s32.totalorder %s894_s14, %s890_s13 }
   0x9   : > { %p47_p2 = scmp.eq.s32.totalorder %s906_s17, 0  ;;  %p606_p4 = scmp.ge.s32.totalorder %s906_s17, 2 }
   0xa   : > { %s1129_s18 = smov (%p34_p0, %s32_s18), 0  ;;  %p658_p6 = scmp.lt.s32.totalorder %s906_s17, 2 }
   0xb   : > { %p973_p3 = por %p47_p2, %p46_p1  ;;  %s36_s21 = ssub.s32 %s902_s16, %s1129_s18 }
   0xc   : > { %p37_p5 = scmp.eq.s32.totalorder %s36_s21, 0  ;;  %s167_s22 = sand.u32 1, %s906_s17  }
   0xd   : > { %s169_s23 = sand.u32 1, %s894_s14   ;;  %s629_s26 = sshll.u32 %s902_s16, 4 }
   0xe   : > { %s984_s24 = scalar_select %p37_p5, %s894_s14, %s39_s19  }
   0xf   : > { %s607_s25 = sshll.u32 %s169_s23, 4  ;;  %s176_s29 = scalar_lea.hbm %s1114_s0, %s629_s26 }
  0x10   : > { %s171_s30 = scalar_lea.vmem [#allocation3], %s607_s25  ;;  %s177_s5 = sshll.u32 %s176_s29, 4  ;;  %s178_s5 = int_to_ptr.hbm [resolvable:$true] %s177_s5 }
  0x11   : > { %s179_s4 = sshll.u32 %s171_s30, 4  ;;  %p992_p7 = pnand %p658_p6, %p973_p3  ;;  %s180_s4 = int_to_ptr.vmem [resolvable:$true] %s179_s4 }
  0x12   : > { %s199_s9 = scalar_lea.hbm %s1116_s2, %s629_s26  ;;  %s999_s10 = scalar_lea.sflag [#allocation4], %s167_s22 }
  0x13   : > { %s908_s11 = smov 128   ;;  %s909_s19 = smov 8  }
  0x14   : > { %649 = dma.hbm_to_vmem [thread:$0]  (!%p992_p7), %s178_s5, 256, %s180_s4, %s999_s10, %s908_s11, %s908_s11, %s909_s19  }
  0x15   : > { %s200_s20 = sshll.u32 %s199_s9, 4  ;;  %s193_s21 = scalar_lea.vmem [#allocation8], %s607_s25  ;;  %s201_s20 = int_to_ptr.hbm [resolvable:$true] %s200_s20 }
  0x16   : > { %s202_s23 = sshll.u32 %s193_s21, 4  ;;  %s1008_s27 = sadd.s32 4294967295, %s906_s17   ;;  %s203_s23 = int_to_ptr.vmem [resolvable:$true] %s202_s23 }
  0x17   : > { %s603_s26 = sadd.s32 4294967294, %s906_s17   ;;  %p52_p8 = scmp.ne.s32.totalorder %s890_s13, %s886_s12 }
  0x18   : > { %p53_p9 = scmp.eq.s32.totalorder %s1008_s27, 0  ;;  %p127_p10 = scmp.eq.s32.totalorder %s1008_s27, 1 }
  0x19   : > { %p133_p11 = scmp.eq.s32.totalorder %s603_s26, 1  ;;  %p604_p12 = scmp.ge.s32.totalorder %s906_s17, 1 }
  0x1a   : > { %p1018_p13 = por %p53_p9, %p52_p8  ;;  %p1025_p0 = por %p127_p10, %p46_p1 }
  0x1b   : > { %p1029_p2 = por %p133_p11, %p52_p8  ;;  %p140_p3 = scmp.lt.s32.totalorder %s906_s17, 3 }
  0x1c   : > { %s151_s4 = sshll.u32 %s1115_s1, 4  ;;  %s910_s5 = smov [#allocation6]   ;;  %s152_s4 = int_to_ptr.hbm [resolvable:$true] %s151_s4 }
  0x1d   : > { %p141_p5 = pnand %p604_p12, %p140_p3  ;;  %s153_s7 = sshll.u32 %s910_s5, 4  ;;  %s154_s7 = int_to_ptr.vmem [resolvable:$true] %s153_s7 }
  0x1e   : > { %652 = dma.hbm_to_vmem [thread:$0]  (!%p992_p7), %s201_s20, 256, %s203_s23, %s999_s10, %s908_s11, %s908_s11, %s909_s19  }
  0x1f   : > { %p642_p6 = pneg %p141_p5  ;;  %214 = sbr.rel (%p141_p5) target bundleno = 729 (0x2d9), region = 32 }
  0x20   : > { %s216_s8 = sand.u32 (!%p141_p5), 1, %s1008_s27   ;;  %s218_s9 = sand.u32 (!%p141_p5), 1, %s890_s13  }
  0x21   : > { %p643_p1 = pnand %p642_p6, %p53_p9  ;;  %s1052_s21 = sshll.u32 (!%p141_p5), %s218_s9, 4 }
  0x22   : > { %s217_s6 = scalar_lea.sflag (!%p141_p5), [#allocation4], %s216_s8  ;;  %s220_s26 = scalar_lea.vmem (!%p141_p5), [#allocation3], %s1052_s21 }
  0x23   : > { %645 = dma.hbm_to_vmem [thread:$0]  (!%p643_p1), %s152_s4, 256, %s154_s7, [#allocation7], %s908_s11, %s908_s11, %s909_s19  }
  0x24   : > { %869 = dma.done.wait (%p1018_p13), %s217_s6, 256  }
  0x25   : > { %871 = vsyncadd (%p1018_p13), %s217_s6, 4294967040 }
  0x26   : > { %873 = dma.done.wait (%p53_p9), [#allocation7], 256  }
  0x27   : > { %875 = vsyncadd (%p53_p9), [#allocation7], 4294967040  ;;  %s235_s10 = scalar_lea.vmem [#allocation8], %s1052_s21 }
  0x28   : > { %877 = dma.done.wait (%p1018_p13), %s217_s6, 256  }
  0x29   : > { %879 = vsyncadd (%p1018_p13), %s217_s6, 4294967040  ;;  %v274_v0 = vld [vmem:[#allocation6 + $0x8] sm:$0xff]  ;;  %v273_v1 = vld [vmem:[#allocation6] sm:$0xff]  ;;  %vm275_vm0 = vcmask 130048   ;;  %vm351_vm1 = vcmask 64512   ;;  %s263_s11 = scalar_lea.vmem [#allocation9], %s1052_s21 }
  0x2a   : > { %296 = vmatpush.msra.mxu0 %v274_v0  ;;  %v271_v2 = vld [vmem:[%s220_s26] sm:$0xff]  ;;  %v272_v3 = vld [vmem:[%s220_s26 + $0x8] sm:$0xff]  ;;  %v309_v6 = vld [vmem:[%s235_s10] sm:$0xff]  ;;  %s631_s19 = sshll.u32 %s898_s15, 4  ;;  %s484_s22 = sshll.u32 %s263_s11, 4  ;;  %s485_s22 = int_to_ptr.vmem [resolvable:$true] %s484_s22 }
  0x2b   : > { %v310_v10 = vld [vmem:[%s235_s10 + $0x8] sm:$0xff]  ;;  %s483_s27 = scalar_lea.hbm %s1117_s3, %s631_s19  ;;  %s471_s15 = scalar_lea.sflag [#allocation5], %s218_s9 }
  0x2c   : > { %297 = vmatpush.msra.mxu0 %v273_v1  ;;  %s486_s29 = sshll.u32 %s483_s27, 4  ;;  %s836_s8 = scalar_lea.hbm %s1117_s3, 32  ;;  %s487_s29 = int_to_ptr.hbm [resolvable:$true] %s486_s29 }
  0x2d   : > { %618 = vmatmul.msk.f32.vlgmr.msra.gmra.mxu0 %vm275_vm0, %v271_v2  ;;  %s830_s30 = sshra.s32 %s487_s29, 4  ;;  %s831_s30 = int_to_ptr.hbm [resolvable:$true] %s830_s30 }
  0x2e   : > { %s832_s4 = scalar_lea.hbm %s831_s30, 16  ;;  %p837_p10 = scmp.lt.s32.totalorder %s831_s30, %s1117_s3 }
  0x2f   : > { %p833_p7 = scmp.ne.s32.totalorder %s831_s30, %s832_s4  ;;  %p838_p11 = scmp.lt.s32.totalorder %s836_s8, %s832_s4 }
  0x31   : > { %p834_p8 = pnand %p833_p7, %p1025_p0  ;;  %p839_p12 = por %p838_p11, %p837_p10 }
  0x33   : > { %p835_p9 = pneg %p834_p8 }
  0x35   : > { %619 = vmatmul.msk.f32.gmra.mxu0 %vm275_vm0, %v272_v3  ;;  %p840_p13 = pnand %p839_p12, %p835_p9 }
  0xaa   : > { %v299_v4 = vpop.f32.mrf.mxu0 }
  0xab   : > { %326 = vmatpush.xpose.msra.mxu1 %v299_v4  ;;  %418 = vmatpush.msra.mxu3 %v299_v4 }
  0xae   : > { %327 = vmatmul.f32.vlgmr.msra.gmra.mxu1 %v299_v4 }
  0xb2   : > { %v302_v5 = vpop.f32.mrf.mxu0 }
  0xb3   : > { %346 = vmatpush.xpose.msra.mxu2 %v302_v5  ;;  %441 = vmatpush.msrb.mxu3 %v302_v5 }
  0xb6   : > { %347 = vmatmul.f32.vlgmr.msra.gmra.mxu2 %v302_v5 }
 0x12b   : > { %v328_v7 = vpop.f32.mrf.mxu1 }
 0x12c   : > { %v329_v8 = vadd.f32 %v328_v7, %v309_v6 }
 0x12e   : > { %v352_v9 = vsel %vm351_vm1, %v329_v8, -inf }
 0x12f   : > { %353 = vmax.xlane.f32.xlu0 %v352_v9 }
 0x139   : > { %v348_v11 = vpop.f32.mrf.mxu2 }
 0x13a   : > { %v349_v12 = vadd.f32 %v348_v11, %v310_v10 }
 0x13c   : > { %v355_v13 = vsel %vm351_vm1, %v349_v12, -inf }
 0x13d   : > { %356 = vmax.xlane.f32.xlu0 %v355_v13 }
 0x1a2   : > { %v354_v14 = vpop.xlane.xlu0 %353 }
 0x1a3   : > { %v358_v15 = vsub.f32 %v329_v8, %v354_v14 }
 0x1a5   : > { %v360_v16 = vmul.f32 1.442695, %v358_v15 }
 0x1a7   : > { %714 = vpow2.f32 %v360_v16 }
 0x1ad   : > { %v715_v17 = vpop.eup %714 }
 0x1ae   : > { %v364_v18 = vsel %vm351_vm1, %v715_v17, 0.0 }
 0x1af   : > { %365 = vadd.xlane.f32.xlu1 %v364_v18 }
 0x1b0   : > { %v357_v19 = vpop.xlane.xlu0 %356 }
 0x1b1   : > { %v359_v20 = vsub.f32 %v349_v12, %v357_v19 }
 0x1b3   : > { %v362_v21 = vmul.f32 1.442695, %v359_v20 }
 0x1b5   : > { %716 = vpow2.f32 %v362_v21 }
 0x1bb   : > { %v717_v22 = vpop.eup %716 }
 0x1bc   : > { %v367_v23 = vsel %vm351_vm1, %v717_v22, 0.0 }
 0x1bd   : > { %368 = vadd.xlane.f32.xlu1 %v367_v23 }
 0x222   : > { %v366_v24 = vpop.xlane.xlu1 %365 }
 0x223   : > { %718 = vrcp.f32 %v366_v24  ;;  %v381_v28 = vand.u32 2147483648, %v366_v24  ;;  %v379_v30 = vand.u32 2147483647, %v366_v24  ;;  %vm375_vm3 = vweird.f32 %v366_v24 }
 0x225   : > { %v382_v33 = vor.u32 1.1754944e-38, %v381_v28  ;;  %vm380_vm5 = vcmp.eq.f32.partialorder %v379_v30, 8.507059e+37 }
 0x229   : > { %v719_v25 = vpop.eup %718 }
 0x22a   : > { %v371_v26 = vmul.f32 %v719_v25, %v366_v24  ;;  %vm376_vm2 = vweird.f32 %v719_v25 }
 0x22b   : > { %vm377_vm4 = vmor %vm375_vm3, %vm376_vm2 }
 0x22c   : > { %v372_v27 = vsub.f32 1.0, %v371_v26 }
 0x22e   : > { %v373_v29 = vmul.f32 %v719_v25, %v372_v27 }
 0x230   : > { %v369_v31 = vpop.xlane.xlu1 %368  ;;  %v374_v32 = vadd.f32 %v719_v25, %v373_v29 }
 0x231   : > { %720 = vrcp.f32 %v369_v31  ;;  %v396_v40 = vand.u32 2147483648, %v369_v31  ;;  %v394_v42 = vand.u32 2147483647, %v369_v31  ;;  %vm390_vm7 = vweird.f32 %v369_v31 }
 0x232   : > { %v378_v34 = vsel %vm377_vm4, %v719_v25, %v374_v32 }
 0x233   : > { %v383_v35 = vsel %vm380_vm5, %v382_v33, %v378_v34  ;;  %v397_v44 = vor.u32 1.1754944e-38, %v396_v40  ;;  %vm395_vm9 = vcmp.eq.f32.partialorder %v394_v42, 8.507059e+37 }
 0x234   : > { %v384_v36 = vmul.f32 %v715_v17, %v383_v35 }
 0x236   : > { %620 = vmatmul.msk.f32.vlgmr.msra.gmra.mxu3 %vm351_vm1, %v384_v36 }
 0x237   : > { %v721_v37 = vpop.eup %720 }
 0x238   : > { %v386_v38 = vmul.f32 %v721_v37, %v369_v31  ;;  %vm391_vm6 = vweird.f32 %v721_v37 }
 0x239   : > { %vm392_vm8 = vmor %vm390_vm7, %vm391_vm6 }
 0x23a   : > { %v387_v39 = vsub.f32 1.0, %v386_v38 }
 0x23c   : > { %v388_v41 = vmul.f32 %v721_v37, %v387_v39 }
 0x23e   : > { %v389_v43 = vadd.f32 %v721_v37, %v388_v41 }
 0x240   : > { %v393_v45 = vsel %vm392_vm8, %v721_v37, %v389_v43 }
 0x241   : > { %v398_v46 = vsel %vm395_vm9, %v397_v44, %v393_v45 }
 0x242   : > { %v399_v47 = vmul.f32 %v717_v22, %v398_v46 }
 0x244   : > { %621 = vmatmul.msk.f32.vlgmr.msrb.gmra.mxu3 %vm351_vm1, %v399_v47 }
 0x2b9   : > { %v420_v48 = vpop.f32.mrf.mxu3 }
 0x2ba   : > { %v458_v49 = vmul.f32 1.442695, %v420_v48  ;;  %v452_v50 = vmul.f32 0.5, %v420_v48  ;;  %v448_v52 = vand.u32 2147483647, %v420_v48  ;;  %vm446_vm11 = vcmp.gt.f32.partialorder %v420_v48, 0.0 }
 0x2bc   : > { %722 = vpow2.f32 %v458_v49  ;;  %v454_v51 = vmul.f32 %v452_v50, %v420_v48  ;;  %vm450_vm10 = vcmp.lt.f32.partialorder %v448_v52, 0.001 }
 0x2be   : > { %v456_v54 = vadd.f32 %v454_v51, %v420_v48 }
 0x2c2   : > { %v723_v53 = vpop.eup %722 }
 0x2c3   : > { %v622_v55 = vadd.f32 -1.0, %v723_v53 }
 0x2c5   : > { %v464_v56 = vsel %vm450_vm10, %v456_v54, %v622_v55 }
 0x2c6   : > { %v466_v57 = vsel %vm446_vm11, %v420_v48, %v464_v56 }
 0x2c7   : > { %v443_v58 = vpop.f32.mrf.mxu3  ;;  %468 = vst [vmem:[%s263_s11] sm:$0xff] %v466_v57 }
 0x2c8   : > { %v460_v59 = vmul.f32 1.442695, %v443_v58  ;;  %v453_v60 = vmul.f32 0.5, %v443_v58  ;;  %v449_v62 = vand.u32 2147483647, %v443_v58  ;;  %vm447_vm13 = vcmp.gt.f32.partialorder %v443_v58, 0.0 }
 0x2ca   : > { %724 = vpow2.f32 %v460_v59  ;;  %v455_v61 = vmul.f32 %v453_v60, %v443_v58  ;;  %vm451_vm12 = vcmp.lt.f32.partialorder %v449_v62, 0.001 }
 0x2cc   : > { %v457_v0 = vadd.f32 %v455_v61, %v443_v58 }
 0x2d0   : > { %v725_v63 = vpop.eup %724 }
 0x2d1   : > { %v623_v1 = vadd.f32 -1.0, %v725_v63 }
 0x2d3   : > { %v465_v2 = vsel %vm451_vm12, %v457_v0, %v623_v1 }
 0x2d4   : > { %v467_v3 = vsel %vm447_vm13, %v443_v58, %v465_v2 }
 0x2d5   : > { %469 = vst [vmem:[%s263_s11 + $0x8] sm:$0xff] %v467_v3 }
 0x2d6   : > { %843 = shalt.err (!%p840_p13)
}
 0x2d7   : > { %s911_s9 = smov 128   ;;  %s912_s26 = smov 8  }
 0x2d8   : > { %640 = dma.vmem_to_hbm [thread:$0]  (%p1025_p0), %s485_s22, 256, %s487_s29, %s471_s15, %s911_s9, %s911_s9, %s912_s26  }
 0x2d9 PF: > { %s501_s10 = sand.u32 1, %s886_s12   ;;  %p654_p3 = pnand %p606_p4, %p1029_p2 }
 0x2da   : > { %s502_s11 = scalar_lea.sflag [#allocation5], %s501_s10 }
 0x2db   : > { %p655_p5 = pneg %p654_p3 }
 0x2dd   : > { %881 = dma.done.wait (%p655_p5), %s502_s11, 256  }
 0x2de   : > { %883 = vsyncadd (%p655_p5), %s502_s11, 4294967040  ;;  %s20_s17 = sadd.s32 1, %s906_s17   ;;  %s1123_s12 = smov %s890_s13 }
 0x2df   : > { %p17_p6 = scmp.ge.s32.totalorder %s20_s17, 4   ;;  %s1124_s13 = smov %s894_s14 }
 0x2e0   : > { %s1125_s14 = smov %s984_s24  ;;  %s1126_s15 = smov %s902_s16 }
 0x2e1   : > { %s1127_s16 = smov %s1129_s18  ;;  %19 = sbr.rel (!%p17_p6) target bundleno = 7 (0x7), region = 96 }
 0x2e6   :  { %508 = vsyncpa [#allocation4], 1 }
 0x2e7   :  { %510 = vsyncpa [#allocation4 + $0x1], 1 }
 0x2e8   :  { %511 = vsyncpa [#allocation7], 1 }
 0x2e9   :  { %512 = vsyncpa [#allocation5], 1 }
 0x2ea   :  { %514 = vsyncpa [#allocation5 + $0x1], 1 }

</bundles_post_ra>
